<compile_context>
chip_gen: v7x
topology: tpu7x:2x2x1
jax: 0.10.0
libtpu: 0.0.40
codegen_flags: <defaults>
</compile_context>

<pallas_src>
import functools

import jax
import jax.numpy as jnp
from jax.experimental import pallas as pl
from jax.experimental.pallas import tpu as pltpu


# ---------------------------------------------------------------------------
# Fused Pallas kernel (Nb lane-batched images per grid step)
# ---------------------------------------------------------------------------

def _uncoiler_fused_kernel(x_ref, m_ref, p_ref,
                           w1_ref, b1_ref, w2_ref, b2_ref, w3_ref, b3_ref,
                           o_ref, pat_ref, *, W):
    """conv3x3+ReLU -> conv1x1 -> conv3x3+ReLU -> global avg pool, fully fused.

    Layouts (lane-dense; L = Nb*H*W lanes, Nb images stacked image-major):
      x_ref : (1, Cin_p, L)   input, channels zero-padded to a multiple of 8
      m_ref : (9, 1, L) f32   per-tap border masks (tiled per image)
      p_ref : (L, Nb)  f32    block-diagonal 1/HW pooling matrix
      w1_ref: (Cmid, 9*Cin_p) bf16 im2col weights of conv1 (3x3, pad=1)
      b1_ref: (Cmid, 1) f32
      w2_ref: (Cmid, Cmid)    bf16 trans1 1x1 conv weights
      b2_ref: (Cmid, 1) f32
      w3_ref: (Cout, 9*Cmid)  bf16 im2col weights of conv3 (3x3, pad=1)
      b3_ref: (Cout, 1) f32
      o_ref : (1, Cout, Nb)   per-image globally average-pooled output
      pat_ref: (9*Cmax, L) f32 VMEM scratch, reused by both 3x3 convs
    """
    f32 = jnp.float32
    bf16 = jnp.bfloat16
    L = x_ref.shape[-1]

    def conv3x3(act, w_ref_, b_ref_):
        """3x3 conv (padding=1) as a single im2col MXU contraction.

        The 9 shifted taps are lane rotations of `act` (pltpu.roll, XLU),
        multiplied by a precomputed border-mask row (one vmul, skipped for the
        center tap), written into the shared VMEM patch scratch and contracted
        with the bf16 im2col weights in ONE matmul (f32 accumulation).
        """
        c = act.shape[0]
        t = 0
        for kh in range(3):                       # static unroll (9 taps)
            for kw in range(3):
                dh, dw = kh - 1, kw - 1
                # output lane q reads input lane q + dh*W + dw (mod L);
                # the per-image mask zeroes borders & any cross-image wrap.
                shift = (-(dh * W + dw)) % L
                tap = pltpu.roll(act, shift, axis=1) if shift else act
                if dh or dw:
                    tap = tap * m_ref[t]          # (1, L) mask row
                pat_ref[pl.ds(t * c, c), :] = tap
                t += 1
        patches = pat_ref[pl.ds(0, 9 * c), :].astype(bf16)    # (9*c, L)
        return (jnp.dot(w_ref_[...], patches, preferred_element_type=f32)
                + b_ref_[...])

    x = x_ref[0].astype(f32)                                   # (Cin_p, L)
    # features_0 (3x3 conv) + features_1 (ReLU), fused.
    a1 = jnp.maximum(conv3x3(x, w1_ref, b1_ref), 0.0)          # (Cmid, L)
    # trans1: 1x1 conv == plain channel matmul, no activation.
    a2 = (jnp.dot(w2_ref[...], a1.astype(bf16),
                  preferred_element_type=f32) + b2_ref[...])   # (Cmid, L)
    # classifier_block_0 (3x3 conv) + classifier_block_1 (ReLU), fused.
    a3 = jnp.maximum(conv3x3(a2, w3_ref, b3_ref), 0.0)         # (Cout, L)

    # Global average pool fused as one MXU matmul with the block-diagonal
    # pooling matrix -> lane-dense (Cout, Nb) store.
    # Matches torch avg_pool2d(x, x.size(3)) + flatten for square maps.
    o_ref[0] = jnp.dot(a3, p_ref[...],
                       preferred_element_type=f32).astype(o_ref.dtype)


# ---------------------------------------------------------------------------
# Wrapper
# ---------------------------------------------------------------------------

def _im2col_weights(w_hwio, cin_pad=0):
    """HWIO (KH, KW, Cin, Cout) -> (Cout, KH*KW*(Cin+cin_pad)).

    Column order matches the kernel's tap stacking: kh outer, kw inner,
    input channel fastest. Padded input channels get zero weights.
    """
    kh, kw, cin, cout = w_hwio.shape
    w = jnp.pad(w_hwio, ((0, 0), (0, 0), (0, cin_pad), (0, 0)))
    return jnp.transpose(w, (3, 0, 1, 2)).reshape(cout, kh * kw * (cin + cin_pad))


@jax.jit
def uncoiler_forward(x_nchw, params):
    """Reproduces Uncoiler.forward on the uncoiled child sequence.

    x_nchw: (N, C, H, W) float32 (PyTorch layout). Returns (N, C_out) float32.
    """
    N, Cin, H, W = x_nchw.shape
    assert H == W, "avg_pool2d(x, x.size(3)) is a global pool only for square maps"
    HW = H * W
    cin_pad = (-Cin) % 8                    # keep sublane tiles / matmul K 8-aligned
    Cin_p = Cin + cin_pad
    Cmid = params["w3"].shape[2]            # conv3 input channels
    Cout = params["w3"].shape[3]

    # --- lane-batch size: ~8K lanes/step (VMEM-safe on v5e..v7x), and keep the
    # --- grid >= 2 whenever N >= 2 so both v7x TensorCores get work.
    Nb = max(1, min(32, 8192 // HW))
    Nb = min(Nb, max(1, (N + 1) // 2))
    N_pad = -(-N // Nb) * Nb
    G = N_pad // Nb
    L = Nb * HW

    # --- input: NCHW -> (G, Cin_p, Nb*HW), Nb images stacked image-major on lanes
    xg = x_nchw.reshape(N, Cin, HW)
    xg = jnp.pad(xg, ((0, N_pad - N), (0, cin_pad), (0, 0)))
    xg = xg.reshape(G, Nb, Cin_p, HW).transpose(0, 2, 1, 3).reshape(G, Cin_p, L)

    # --- 3x3 border masks (per tap), tiled across the Nb images -> (9, 1, L)
    pos = jnp.arange(HW, dtype=jnp.int32)
    hh, ww = pos // W, pos % W
    rows = []
    for kh in range(3):
        for kw in range(3):
            dh, dw = kh - 1, kw - 1
            rows.append(((hh >= -dh) & (hh < H - dh) &
                         (ww >= -dw) & (ww < W - dw)).astype(jnp.float32))
    mask9 = jnp.tile(jnp.stack(rows, 0).reshape(9, 1, HW), (1, 1, Nb))

    # --- block-diagonal pooling matrix: out = a3 @ pool -> (Cout, Nb)
    pool = jnp.repeat(jnp.eye(Nb, dtype=jnp.float32), HW, axis=0) / float(HW)

    # --- weights: im2col layout, bf16 MXU operands (f32 accumulation in-kernel)
    w1 = _im2col_weights(params["w1"], cin_pad).astype(jnp.bfloat16)   # (Cmid, 9*Cin_p)
    b1 = params["b1"].reshape(-1, 1).astype(jnp.float32)
    w2 = params["w2"][0, 0].T.astype(jnp.bfloat16)                     # (Cmid, Cmid)
    b2 = params["b2"].reshape(-1, 1).astype(jnp.float32)
    w3 = _im2col_weights(params["w3"]).astype(jnp.bfloat16)            # (Cout, 9*Cmid)
    b3 = params["b3"].reshape(-1, 1).astype(jnp.float32)

    Cmax = max(Cin_p, Cmid)
    kernel = functools.partial(_uncoiler_fused_kernel, W=W)
    out = pl.pallas_call(
        kernel,
        out_shape=jax.ShapeDtypeStruct((G, Cout, Nb), jnp.float32),
        grid=(G,),
        in_specs=[
            pl.BlockSpec((1, Cin_p, L), lambda g: (g, 0, 0)),   # lane-batched images
            pl.BlockSpec((9, 1, L), lambda g: (0, 0, 0)),       # border masks (resident)
            pl.BlockSpec((L, Nb), lambda g: (0, 0)),            # pooling matrix (resident)
            pl.BlockSpec(w1.shape, lambda g: (0, 0)),
            pl.BlockSpec(b1.shape, lambda g: (0, 0)),
            pl.BlockSpec(w2.shape, lambda g: (0, 0)),
            pl.BlockSpec(b2.shape, lambda g: (0, 0)),
            pl.BlockSpec(w3.shape, lambda g: (0, 0)),
            pl.BlockSpec(b3.shape, lambda g: (0, 0)),
        ],
        out_specs=pl.BlockSpec((1, Cout, Nb), lambda g: (g, 0, 0)),
        scratch_shapes=[pltpu.VMEM((9 * Cmax, L), jnp.float32)],   # reused im2col patches
        compiler_params=pltpu.CompilerParams(
            dimension_semantics=("parallel",)),       # batch groups across TCs on v7x
    )(xg, mask9, pool, w1, b1, w2, b2, w3, b3)

    # (G, Cout, Nb) -> (N, Cout)
    return out.transpose(0, 2, 1).reshape(N_pad, Cout)[:N]


# ---------------------------------------------------------------------------
# Synthetic "uncoiled" network parameters
# ---------------------------------------------------------------------------

def init_params(key, cin=4, cmid=8, cout=16):
    ks = jax.random.split(key, 6)
    scale = 0.1
    return {
        # features_0: Conv2d(cin, cmid, 3, padding=1)   (HWIO weights)
        "w1": scale * jax.random.normal(ks[0], (3, 3, cin, cmid), jnp.float32),
        "b1": scale * jax.random.normal(ks[1], (1, cmid), jnp.float32),
        # trans1: Conv2d(cmid, cmid, 1)
        "w2": scale * jax.random.normal(ks[2], (1, 1, cmid, cmid), jnp.float32),
        "b2": scale * jax.random.normal(ks[3], (1, cmid), jnp.float32),
        # classifier_block_0: Conv2d(cmid, cout, 3, padding=1)
        "w3": scale * jax.random.normal(ks[4], (3, 3, cmid, cout), jnp.float32),
        "b3": scale * jax.random.normal(ks[5], (1, cout), jnp.float32),
    }


# ---------------------------------------------------------------------------
# Pure-JAX reference for verification
# ---------------------------------------------------------------------------

def _conv_ref(x, w, b, padding, relu):
    out = jax.lax.conv_general_dilated(
        x, w, window_strides=(1, 1),
        padding=((padding, padding), (padding, padding)),
        dimension_numbers=("NHWC", "HWIO", "NHWC"))
    out = out + b.reshape(1, 1, 1, -1)
    return jnp.maximum(out, 0.0) if relu else out


def uncoiler_reference(x_nchw, params):
    x = jnp.transpose(x_nchw, (0, 2, 3, 1))
    x = _conv_ref(x, params["w1"], params["b1"], 1, True)
    x = _conv_ref(x, params["w2"], params["b2"], 0, False)
    x = _conv_ref(x, params["w3"], params["b3"], 1, True)
    return jnp.mean(x, axis=(1, 2))


# ---------------------------------------------------------------------------

if __name__ == "__main__":
    key = jax.random.PRNGKey(0)
    k_x, k_p = jax.random.split(key)

    N, C, H, W = 2, 4, 16, 16                 # PyTorch NCHW input shape
    x_nchw = jax.random.normal(k_x, (N, C, H, W), jnp.float32)
    params = init_params(k_p, cin=C, cmid=8, cout=16)

    out = uncoiler_forward(x_nchw, params)
    out = jax.block_until_ready(out)

    ref = uncoiler_reference(x_nchw, params)
    assert out.shape == (N, 16), out.shape
    # Tolerance accounts for bf16 MXU inputs (f32 accumulation) vs the f32 reference.
    assert jnp.allclose(out, ref, atol=1e-2, rtol=1e-2), (
        float(jnp.max(jnp.abs(out - ref))))

    print("KERNEL_OK")
</pallas_src>

<mosaic_0001>
module attributes {stable_mosaic.version = 11 : i64} {
  func.func @_uncoiler_fused_kernel(%arg0: i32, %arg1: memref<1x8x256xf32, #tpu.memory_space<vmem>>, %arg2: memref<9x1x256xf32, #tpu.memory_space<vmem>>, %arg3: memref<256x1xf32, #tpu.memory_space<vmem>>, %arg4: memref<8x72xbf16, #tpu.memory_space<vmem>>, %arg5: memref<8x1xf32, #tpu.memory_space<vmem>>, %arg6: memref<8x8xbf16, #tpu.memory_space<vmem>>, %arg7: memref<8x1xf32, #tpu.memory_space<vmem>>, %arg8: memref<16x72xbf16, #tpu.memory_space<vmem>>, %arg9: memref<16x1xf32, #tpu.memory_space<vmem>>, %arg10: memref<1x16x1xf32, #tpu.memory_space<vmem>>, %arg11: memref<72x256xf32, #tpu.memory_space<vmem>>) attributes {dimension_semantics = [#tpu.dimension_semantics<parallel>], iteration_bounds = array<i64: 2>, scalar_prefetch = 0 : i64, scratch_operands = 1 : i64, tpu.core_type = #tpu.core_type<tc>, window_params = [{transform_indices = @transform_0, window_bounds = array<i64: 1, 8, 256>}, {pipeline_mode = #tpu.pipeline_mode<synchronous>, transform_indices = @transform_1, window_bounds = array<i64: 9, 1, 256>}, {pipeline_mode = #tpu.pipeline_mode<synchronous>, transform_indices = @transform_2, window_bounds = array<i64: 256, 1>}, {pipeline_mode = #tpu.pipeline_mode<synchronous>, transform_indices = @transform_3, window_bounds = array<i64: 8, 72>}, {pipeline_mode = #tpu.pipeline_mode<synchronous>, transform_indices = @transform_4, window_bounds = array<i64: 8, 1>}, {pipeline_mode = #tpu.pipeline_mode<synchronous>, transform_indices = @transform_5, window_bounds = array<i64: 8, 8>}, {pipeline_mode = #tpu.pipeline_mode<synchronous>, transform_indices = @transform_6, window_bounds = array<i64: 8, 1>}, {pipeline_mode = #tpu.pipeline_mode<synchronous>, transform_indices = @transform_7, window_bounds = array<i64: 16, 72>}, {pipeline_mode = #tpu.pipeline_mode<synchronous>, transform_indices = @transform_8, window_bounds = array<i64: 16, 1>}, {transform_indices = @transform_9, window_bounds = array<i64: 1, 16, 1>}]} {
    %c0 = arith.constant 0 : index
    %c0_0 = arith.constant 0 : index
    %c0_1 = arith.constant 0 : index
    %0 = vector.load %arg1[%c0, %c0_0, %c0_1] : memref<1x8x256xf32, #tpu.memory_space<vmem>>, vector<1x8x256xf32>
    %1 = vector.shape_cast %0 : vector<1x8x256xf32> to vector<8x256xf32>
    %c17_i32 = arith.constant 17 : i32
    %2 = tpu.dynamic_rotate %1 by %c17_i32 dim 1 : vector<8x256xf32>, i32 -> vector<8x256xf32>
    %c0_2 = arith.constant 0 : index
    %c0_3 = arith.constant 0 : index
    %c0_4 = arith.constant 0 : index
    %3 = vector.load %arg2[%c0_2, %c0_3, %c0_4] : memref<9x1x256xf32, #tpu.memory_space<vmem>>, vector<1x1x256xf32>
    %4 = vector.shape_cast %3 : vector<1x1x256xf32> to vector<1x256xf32>
    %5 = vector.broadcast %4 : vector<1x256xf32> to vector<8x256xf32>
    %6 = arith.mulf %2, %5 : vector<8x256xf32>
    %c0_5 = arith.constant 0 : index
    %c0_6 = arith.constant 0 : index
    %7 = vector.load %arg11[%c0_5, %c0_6] : memref<72x256xf32, #tpu.memory_space<vmem>>, vector<8x256xf32>
    tpu.vector_store %arg11[%c0_5, %c0_6], %6 {strides = array<i32>} : memref<72x256xf32, #tpu.memory_space<vmem>>, vector<8x256xf32>,
    %c16_i32 = arith.constant 16 : i32
    %8 = tpu.dynamic_rotate %1 by %c16_i32 dim 1 : vector<8x256xf32>, i32 -> vector<8x256xf32>
    %c1 = arith.constant 1 : index
    %c0_7 = arith.constant 0 : index
    %c0_8 = arith.constant 0 : index
    %9 = vector.load %arg2[%c1, %c0_7, %c0_8] : memref<9x1x256xf32, #tpu.memory_space<vmem>>, vector<1x1x256xf32>
    %10 = vector.shape_cast %9 : vector<1x1x256xf32> to vector<1x256xf32>
    %11 = vector.broadcast %10 : vector<1x256xf32> to vector<8x256xf32>
    %12 = arith.mulf %8, %11 : vector<8x256xf32>
    %c8 = arith.constant 8 : index
    %c0_9 = arith.constant 0 : index
    %13 = vector.load %arg11[%c8, %c0_9] : memref<72x256xf32, #tpu.memory_space<vmem>>, vector<8x256xf32>
    tpu.vector_store %arg11[%c8, %c0_9], %12 {strides = array<i32>} : memref<72x256xf32, #tpu.memory_space<vmem>>, vector<8x256xf32>,
    %c15_i32 = arith.constant 15 : i32
    %14 = tpu.dynamic_rotate %1 by %c15_i32 dim 1 : vector<8x256xf32>, i32 -> vector<8x256xf32>
    %c2 = arith.constant 2 : index
    %c0_10 = arith.constant 0 : index
    %c0_11 = arith.constant 0 : index
    %15 = vector.load %arg2[%c2, %c0_10, %c0_11] : memref<9x1x256xf32, #tpu.memory_space<vmem>>, vector<1x1x256xf32>
    %16 = vector.shape_cast %15 : vector<1x1x256xf32> to vector<1x256xf32>
    %17 = vector.broadcast %16 : vector<1x256xf32> to vector<8x256xf32>
    %18 = arith.mulf %14, %17 : vector<8x256xf32>
    %c16 = arith.constant 16 : index
    %c0_12 = arith.constant 0 : index
    %19 = vector.load %arg11[%c16, %c0_12] : memref<72x256xf32, #tpu.memory_space<vmem>>, vector<8x256xf32>
    tpu.vector_store %arg11[%c16, %c0_12], %18 {strides = array<i32>} : memref<72x256xf32, #tpu.memory_space<vmem>>, vector<8x256xf32>,
    %c1_i32 = arith.constant 1 : i32
    %20 = tpu.dynamic_rotate %1 by %c1_i32 dim 1 : vector<8x256xf32>, i32 -> vector<8x256xf32>
    %c3 = arith.constant 3 : index
    %c0_13 = arith.constant 0 : index
    %c0_14 = arith.constant 0 : index
    %21 = vector.load %arg2[%c3, %c0_13, %c0_14] : memref<9x1x256xf32, #tpu.memory_space<vmem>>, vector<1x1x256xf32>
    %22 = vector.shape_cast %21 : vector<1x1x256xf32> to vector<1x256xf32>
    %23 = vector.broadcast %22 : vector<1x256xf32> to vector<8x256xf32>
    %24 = arith.mulf %20, %23 : vector<8x256xf32>
    %c24 = arith.constant 24 : index
    %c0_15 = arith.constant 0 : index
    %25 = vector.load %arg11[%c24, %c0_15] : memref<72x256xf32, #tpu.memory_space<vmem>>, vector<8x256xf32>
    tpu.vector_store %arg11[%c24, %c0_15], %24 {strides = array<i32>} : memref<72x256xf32, #tpu.memory_space<vmem>>, vector<8x256xf32>,
    %c32 = arith.constant 32 : index
    %c0_16 = arith.constant 0 : index
    %26 = vector.load %arg11[%c32, %c0_16] : memref<72x256xf32, #tpu.memory_space<vmem>>, vector<8x256xf32>
    tpu.vector_store %arg11[%c32, %c0_16], %1 {strides = array<i32>} : memref<72x256xf32, #tpu.memory_space<vmem>>, vector<8x256xf32>,
    %c255_i32 = arith.constant 255 : i32
    %27 = tpu.dynamic_rotate %1 by %c255_i32 dim 1 : vector<8x256xf32>, i32 -> vector<8x256xf32>
    %c5 = arith.constant 5 : index
    %c0_17 = arith.constant 0 : index
    %c0_18 = arith.constant 0 : index
    %28 = vector.load %arg2[%c5, %c0_17, %c0_18] : memref<9x1x256xf32, #tpu.memory_space<vmem>>, vector<1x1x256xf32>
    %29 = vector.shape_cast %28 : vector<1x1x256xf32> to vector<1x256xf32>
    %30 = vector.broadcast %29 : vector<1x256xf32> to vector<8x256xf32>
    %31 = arith.mulf %27, %30 : vector<8x256xf32>
    %c40 = arith.constant 40 : index
    %c0_19 = arith.constant 0 : index
    %32 = vector.load %arg11[%c40, %c0_19] : memref<72x256xf32, #tpu.memory_space<vmem>>, vector<8x256xf32>
    tpu.vector_store %arg11[%c40, %c0_19], %31 {strides = array<i32>} : memref<72x256xf32, #tpu.memory_space<vmem>>, vector<8x256xf32>,
    %c241_i32 = arith.constant 241 : i32
    %33 = tpu.dynamic_rotate %1 by %c241_i32 dim 1 : vector<8x256xf32>, i32 -> vector<8x256xf32>
    %c6 = arith.constant 6 : index
    %c0_20 = arith.constant 0 : index
    %c0_21 = arith.constant 0 : index
    %34 = vector.load %arg2[%c6, %c0_20, %c0_21] : memref<9x1x256xf32, #tpu.memory_space<vmem>>, vector<1x1x256xf32>
    %35 = vector.shape_cast %34 : vector<1x1x256xf32> to vector<1x256xf32>
    %36 = vector.broadcast %35 : vector<1x256xf32> to vector<8x256xf32>
    %37 = arith.mulf %33, %36 : vector<8x256xf32>
    %c48 = arith.constant 48 : index
    %c0_22 = arith.constant 0 : index
    %38 = vector.load %arg11[%c48, %c0_22] : memref<72x256xf32, #tpu.memory_space<vmem>>, vector<8x256xf32>
    tpu.vector_store %arg11[%c48, %c0_22], %37 {strides = array<i32>} : memref<72x256xf32, #tpu.memory_space<vmem>>, vector<8x256xf32>,
    %c240_i32 = arith.constant 240 : i32
    %39 = tpu.dynamic_rotate %1 by %c240_i32 dim 1 : vector<8x256xf32>, i32 -> vector<8x256xf32>
    %c7 = arith.constant 7 : index
    %c0_23 = arith.constant 0 : index
    %c0_24 = arith.constant 0 : index
    %40 = vector.load %arg2[%c7, %c0_23, %c0_24] : memref<9x1x256xf32, #tpu.memory_space<vmem>>, vector<1x1x256xf32>
    %41 = vector.shape_cast %40 : vector<1x1x256xf32> to vector<1x256xf32>
    %42 = vector.broadcast %41 : vector<1x256xf32> to vector<8x256xf32>
    %43 = arith.mulf %39, %42 : vector<8x256xf32>
    %c56 = arith.constant 56 : index
    %c0_25 = arith.constant 0 : index
    %44 = vector.load %arg11[%c56, %c0_25] : memref<72x256xf32, #tpu.memory_space<vmem>>, vector<8x256xf32>
    tpu.vector_store %arg11[%c56, %c0_25], %43 {strides = array<i32>} : memref<72x256xf32, #tpu.memory_space<vmem>>, vector<8x256xf32>,
    %c239_i32 = arith.constant 239 : i32
    %45 = tpu.dynamic_rotate %1 by %c239_i32 dim 1 : vector<8x256xf32>, i32 -> vector<8x256xf32>
    %c8_26 = arith.constant 8 : index
    %c0_27 = arith.constant 0 : index
    %c0_28 = arith.constant 0 : index
    %46 = vector.load %arg2[%c8_26, %c0_27, %c0_28] : memref<9x1x256xf32, #tpu.memory_space<vmem>>, vector<1x1x256xf32>
    %47 = vector.shape_cast %46 : vector<1x1x256xf32> to vector<1x256xf32>
    %48 = vector.broadcast %47 : vector<1x256xf32> to vector<8x256xf32>
    %49 = arith.mulf %45, %48 : vector<8x256xf32>
    %c64 = arith.constant 64 : index
    %c0_29 = arith.constant 0 : index
    %50 = vector.load %arg11[%c64, %c0_29] : memref<72x256xf32, #tpu.memory_space<vmem>>, vector<8x256xf32>
    tpu.vector_store %arg11[%c64, %c0_29], %49 {strides = array<i32>} : memref<72x256xf32, #tpu.memory_space<vmem>>, vector<8x256xf32>,
    %c0_30 = arith.constant 0 : index
    %c0_31 = arith.constant 0 : index
    %51 = vector.load %arg11[%c0_30, %c0_31] : memref<72x256xf32, #tpu.memory_space<vmem>>, vector<72x256xf32>
    %52 = arith.truncf %51 : vector<72x256xf32> to vector<72x256xbf16>
    %c0_32 = arith.constant 0 : index
    %c0_33 = arith.constant 0 : index
    %53 = vector.load %arg4[%c0_32, %c0_33] : memref<8x72xbf16, #tpu.memory_space<vmem>>, vector<8x72xbf16>
    %cst = arith.constant dense<0.000000e+00> : vector<8x256xf32>
    %54 = tpu.matmul %53, %52, %cst {dimension_numbers = #tpu.dot_dimension_numbers<[1], [0], [0], [1], [0, 0, 1, 1], [], []>} : vector<8x72xbf16>, vector<72x256xbf16>, vector<8x256xf32> -> vector<8x256xf32>
    %c0_34 = arith.constant 0 : index
    %c0_35 = arith.constant 0 : index
    %55 = vector.load %arg5[%c0_34, %c0_35] : memref<8x1xf32, #tpu.memory_space<vmem>>, vector<8x1xf32>
    %56 = vector.broadcast %55 : vector<8x1xf32> to vector<8x256xf32>
    %57 = arith.addf %54, %56 : vector<8x256xf32>
    %cst_36 = arith.constant 0.000000e+00 : f32
    %58 = vector.broadcast %cst_36 : f32 to vector<8x256xf32>
    %59 = arith.maximumf %57, %58 : vector<8x256xf32>
    %c0_37 = arith.constant 0 : index
    %c0_38 = arith.constant 0 : index
    %60 = vector.load %arg6[%c0_37, %c0_38] : memref<8x8xbf16, #tpu.memory_space<vmem>>, vector<8x8xbf16>
    %61 = arith.truncf %59 : vector<8x256xf32> to vector<8x256xbf16>
    %cst_39 = arith.constant dense<0.000000e+00> : vector<8x256xf32>
    %62 = tpu.matmul %60, %61, %cst_39 {dimension_numbers = #tpu.dot_dimension_numbers<[1], [0], [0], [1], [0, 0, 1, 1], [], []>} : vector<8x8xbf16>, vector<8x256xbf16>, vector<8x256xf32> -> vector<8x256xf32>
    %c0_40 = arith.constant 0 : index
    %c0_41 = arith.constant 0 : index
    %63 = vector.load %arg7[%c0_40, %c0_41] : memref<8x1xf32, #tpu.memory_space<vmem>>, vector<8x1xf32>
    %64 = vector.broadcast %63 : vector<8x1xf32> to vector<8x256xf32>
    %65 = arith.addf %62, %64 : vector<8x256xf32>
    %c17_i32_42 = arith.constant 17 : i32
    %66 = tpu.dynamic_rotate %65 by %c17_i32_42 dim 1 : vector<8x256xf32>, i32 -> vector<8x256xf32>
    %c0_43 = arith.constant 0 : index
    %c0_44 = arith.constant 0 : index
    %c0_45 = arith.constant 0 : index
    %67 = vector.load %arg2[%c0_43, %c0_44, %c0_45] : memref<9x1x256xf32, #tpu.memory_space<vmem>>, vector<1x1x256xf32>
    %68 = vector.shape_cast %67 : vector<1x1x256xf32> to vector<1x256xf32>
    %69 = vector.broadcast %68 : vector<1x256xf32> to vector<8x256xf32>
    %70 = arith.mulf %66, %69 : vector<8x256xf32>
    %c0_46 = arith.constant 0 : index
    %c0_47 = arith.constant 0 : index
    %71 = vector.load %arg11[%c0_46, %c0_47] : memref<72x256xf32, #tpu.memory_space<vmem>>, vector<8x256xf32>
    tpu.vector_store %arg11[%c0_46, %c0_47], %70 {strides = array<i32>} : memref<72x256xf32, #tpu.memory_space<vmem>>, vector<8x256xf32>,
    %c16_i32_48 = arith.constant 16 : i32
    %72 = tpu.dynamic_rotate %65 by %c16_i32_48 dim 1 : vector<8x256xf32>, i32 -> vector<8x256xf32>
    %c1_49 = arith.constant 1 : index
    %c0_50 = arith.constant 0 : index
    %c0_51 = arith.constant 0 : index
    %73 = vector.load %arg2[%c1_49, %c0_50, %c0_51] : memref<9x1x256xf32, #tpu.memory_space<vmem>>, vector<1x1x256xf32>
    %74 = vector.shape_cast %73 : vector<1x1x256xf32> to vector<1x256xf32>
    %75 = vector.broadcast %74 : vector<1x256xf32> to vector<8x256xf32>
    %76 = arith.mulf %72, %75 : vector<8x256xf32>
    %c8_52 = arith.constant 8 : index
    %c0_53 = arith.constant 0 : index
    %77 = vector.load %arg11[%c8_52, %c0_53] : memref<72x256xf32, #tpu.memory_space<vmem>>, vector<8x256xf32>
    tpu.vector_store %arg11[%c8_52, %c0_53], %76 {strides = array<i32>} : memref<72x256xf32, #tpu.memory_space<vmem>>, vector<8x256xf32>,
    %c15_i32_54 = arith.constant 15 : i32
    %78 = tpu.dynamic_rotate %65 by %c15_i32_54 dim 1 : vector<8x256xf32>, i32 -> vector<8x256xf32>
    %c2_55 = arith.constant 2 : index
    %c0_56 = arith.constant 0 : index
    %c0_57 = arith.constant 0 : index
    %79 = vector.load %arg2[%c2_55, %c0_56, %c0_57] : memref<9x1x256xf32, #tpu.memory_space<vmem>>, vector<1x1x256xf32>
    %80 = vector.shape_cast %79 : vector<1x1x256xf32> to vector<1x256xf32>
    %81 = vector.broadcast %80 : vector<1x256xf32> to vector<8x256xf32>
    %82 = arith.mulf %78, %81 : vector<8x256xf32>
    %c16_58 = arith.constant 16 : index
    %c0_59 = arith.constant 0 : index
    %83 = vector.load %arg11[%c16_58, %c0_59] : memref<72x256xf32, #tpu.memory_space<vmem>>, vector<8x256xf32>
    tpu.vector_store %arg11[%c16_58, %c0_59], %82 {strides = array<i32>} : memref<72x256xf32, #tpu.memory_space<vmem>>, vector<8x256xf32>,
    %c1_i32_60 = arith.constant 1 : i32
    %84 = tpu.dynamic_rotate %65 by %c1_i32_60 dim 1 : vector<8x256xf32>, i32 -> vector<8x256xf32>
    %c3_61 = arith.constant 3 : index
    %c0_62 = arith.constant 0 : index
    %c0_63 = arith.constant 0 : index
    %85 = vector.load %arg2[%c3_61, %c0_62, %c0_63] : memref<9x1x256xf32, #tpu.memory_space<vmem>>, vector<1x1x256xf32>
    %86 = vector.shape_cast %85 : vector<1x1x256xf32> to vector<1x256xf32>
    %87 = vector.broadcast %86 : vector<1x256xf32> to vector<8x256xf32>
    %88 = arith.mulf %84, %87 : vector<8x256xf32>
    %c24_64 = arith.constant 24 : index
    %c0_65 = arith.constant 0 : index
    %89 = vector.load %arg11[%c24_64, %c0_65] : memref<72x256xf32, #tpu.memory_space<vmem>>, vector<8x256xf32>
    tpu.vector_store %arg11[%c24_64, %c0_65], %88 {strides = array<i32>} : memref<72x256xf32, #tpu.memory_space<vmem>>, vector<8x256xf32>,
    %c32_66 = arith.constant 32 : index
    %c0_67 = arith.constant 0 : index
    %90 = vector.load %arg11[%c32_66, %c0_67] : memref<72x256xf32, #tpu.memory_space<vmem>>, vector<8x256xf32>
    tpu.vector_store %arg11[%c32_66, %c0_67], %65 {strides = array<i32>} : memref<72x256xf32, #tpu.memory_space<vmem>>, vector<8x256xf32>,
    %c255_i32_68 = arith.constant 255 : i32
    %91 = tpu.dynamic_rotate %65 by %c255_i32_68 dim 1 : vector<8x256xf32>, i32 -> vector<8x256xf32>
    %c5_69 = arith.constant 5 : index
    %c0_70 = arith.constant 0 : index
    %c0_71 = arith.constant 0 : index
    %92 = vector.load %arg2[%c5_69, %c0_70, %c0_71] : memref<9x1x256xf32, #tpu.memory_space<vmem>>, vector<1x1x256xf32>
    %93 = vector.shape_cast %92 : vector<1x1x256xf32> to vector<1x256xf32>
    %94 = vector.broadcast %93 : vector<1x256xf32> to vector<8x256xf32>
    %95 = arith.mulf %91, %94 : vector<8x256xf32>
    %c40_72 = arith.constant 40 : index
    %c0_73 = arith.constant 0 : index
    %96 = vector.load %arg11[%c40_72, %c0_73] : memref<72x256xf32, #tpu.memory_space<vmem>>, vector<8x256xf32>
    tpu.vector_store %arg11[%c40_72, %c0_73], %95 {strides = array<i32>} : memref<72x256xf32, #tpu.memory_space<vmem>>, vector<8x256xf32>,
    %c241_i32_74 = arith.constant 241 : i32
    %97 = tpu.dynamic_rotate %65 by %c241_i32_74 dim 1 : vector<8x256xf32>, i32 -> vector<8x256xf32>
    %c6_75 = arith.constant 6 : index
    %c0_76 = arith.constant 0 : index
    %c0_77 = arith.constant 0 : index
    %98 = vector.load %arg2[%c6_75, %c0_76, %c0_77] : memref<9x1x256xf32, #tpu.memory_space<vmem>>, vector<1x1x256xf32>
    %99 = vector.shape_cast %98 : vector<1x1x256xf32> to vector<1x256xf32>
    %100 = vector.broadcast %99 : vector<1x256xf32> to vector<8x256xf32>
    %101 = arith.mulf %97, %100 : vector<8x256xf32>
    %c48_78 = arith.constant 48 : index
    %c0_79 = arith.constant 0 : index
    %102 = vector.load %arg11[%c48_78, %c0_79] : memref<72x256xf32, #tpu.memory_space<vmem>>, vector<8x256xf32>
    tpu.vector_store %arg11[%c48_78, %c0_79], %101 {strides = array<i32>} : memref<72x256xf32, #tpu.memory_space<vmem>>, vector<8x256xf32>,
    %c240_i32_80 = arith.constant 240 : i32
    %103 = tpu.dynamic_rotate %65 by %c240_i32_80 dim 1 : vector<8x256xf32>, i32 -> vector<8x256xf32>
    %c7_81 = arith.constant 7 : index
    %c0_82 = arith.constant 0 : index
    %c0_83 = arith.constant 0 : index
    %104 = vector.load %arg2[%c7_81, %c0_82, %c0_83] : memref<9x1x256xf32, #tpu.memory_space<vmem>>, vector<1x1x256xf32>
    %105 = vector.shape_cast %104 : vector<1x1x256xf32> to vector<1x256xf32>
    %106 = vector.broadcast %105 : vector<1x256xf32> to vector<8x256xf32>
    %107 = arith.mulf %103, %106 : vector<8x256xf32>
    %c56_84 = arith.constant 56 : index
    %c0_85 = arith.constant 0 : index
    %108 = vector.load %arg11[%c56_84, %c0_85] : memref<72x256xf32, #tpu.memory_space<vmem>>, vector<8x256xf32>
    tpu.vector_store %arg11[%c56_84, %c0_85], %107 {strides = array<i32>} : memref<72x256xf32, #tpu.memory_space<vmem>>, vector<8x256xf32>,
    %c239_i32_86 = arith.constant 239 : i32
    %109 = tpu.dynamic_rotate %65 by %c239_i32_86 dim 1 : vector<8x256xf32>, i32 -> vector<8x256xf32>
    %c8_87 = arith.constant 8 : index
    %c0_88 = arith.constant 0 : index
    %c0_89 = arith.constant 0 : index
    %110 = vector.load %arg2[%c8_87, %c0_88, %c0_89] : memref<9x1x256xf32, #tpu.memory_space<vmem>>, vector<1x1x256xf32>
    %111 = vector.shape_cast %110 : vector<1x1x256xf32> to vector<1x256xf32>
    %112 = vector.broadcast %111 : vector<1x256xf32> to vector<8x256xf32>
    %113 = arith.mulf %109, %112 : vector<8x256xf32>
    %c64_90 = arith.constant 64 : index
    %c0_91 = arith.constant 0 : index
    %114 = vector.load %arg11[%c64_90, %c0_91] : memref<72x256xf32, #tpu.memory_space<vmem>>, vector<8x256xf32>
    tpu.vector_store %arg11[%c64_90, %c0_91], %113 {strides = array<i32>} : memref<72x256xf32, #tpu.memory_space<vmem>>, vector<8x256xf32>,
    %c0_92 = arith.constant 0 : index
    %c0_93 = arith.constant 0 : index
    %115 = vector.load %arg11[%c0_92, %c0_93] : memref<72x256xf32, #tpu.memory_space<vmem>>, vector<72x256xf32>
    %116 = arith.truncf %115 : vector<72x256xf32> to vector<72x256xbf16>
    %c0_94 = arith.constant 0 : index
    %c0_95 = arith.constant 0 : index
    %117 = vector.load %arg8[%c0_94, %c0_95] : memref<16x72xbf16, #tpu.memory_space<vmem>>, vector<16x72xbf16>
    %cst_96 = arith.constant dense<0.000000e+00> : vector<16x256xf32>
    %118 = tpu.matmul %117, %116, %cst_96 {dimension_numbers = #tpu.dot_dimension_numbers<[1], [0], [0], [1], [0, 0, 1, 1], [], []>} : vector<16x72xbf16>, vector<72x256xbf16>, vector<16x256xf32> -> vector<16x256xf32>
    %c0_97 = arith.constant 0 : index
    %c0_98 = arith.constant 0 : index
    %119 = vector.load %arg9[%c0_97, %c0_98] : memref<16x1xf32, #tpu.memory_space<vmem>>, vector<16x1xf32>
    %120 = vector.broadcast %119 : vector<16x1xf32> to vector<16x256xf32>
    %121 = arith.addf %118, %120 : vector<16x256xf32>
    %cst_99 = arith.constant 0.000000e+00 : f32
    %122 = vector.broadcast %cst_99 : f32 to vector<16x256xf32>
    %123 = arith.maximumf %121, %122 : vector<16x256xf32>
    %c0_100 = arith.constant 0 : index
    %c0_101 = arith.constant 0 : index
    %124 = vector.load %arg3[%c0_100, %c0_101] : memref<256x1xf32, #tpu.memory_space<vmem>>, vector<256x1xf32>
    %cst_102 = arith.constant dense<0.000000e+00> : vector<16x1xf32>
    %125 = tpu.matmul %123, %124, %cst_102 {dimension_numbers = #tpu.dot_dimension_numbers<[1], [0], [0], [1], [0, 0, 1, 1], [], []>} : vector<16x256xf32>, vector<256x1xf32>, vector<16x1xf32> -> vector<16x1xf32>
    %c0_103 = arith.constant 0 : index
    %c0_104 = arith.constant 0 : index
    %c0_105 = arith.constant 0 : index
    %126 = vector.load %arg10[%c0_103, %c0_104, %c0_105] : memref<1x16x1xf32, #tpu.memory_space<vmem>>, vector<1x16x1xf32>
    %127 = vector.shape_cast %126 : vector<1x16x1xf32> to vector<16x1xf32>
    %128 = vector.shape_cast %125 : vector<16x1xf32> to vector<1x16x1xf32>
    tpu.vector_store %arg10[%c0_103, %c0_104, %c0_105], %128 {strides = array<i32>} : memref<1x16x1xf32, #tpu.memory_space<vmem>>, vector<1x16x1xf32>,
    return
  }
  func.func @transform_0(%arg0: i32) -> (i32, i32, i32) {
    %c0_i32 = arith.constant 0 : i32
    %c0_i32_0 = arith.constant 0 : i32
    %c0_i32_1 = arith.constant 0 : i32
    return %arg0, %c0_i32, %c0_i32_0 : i32, i32, i32
  }
  func.func @transform_1(%arg0: i32) -> (i32, i32, i32) {
    %c0_i32 = arith.constant 0 : i32
    %c0_i32_0 = arith.constant 0 : i32
    %c0_i32_1 = arith.constant 0 : i32
    %c0_i32_2 = arith.constant 0 : i32
    return %c0_i32, %c0_i32_0, %c0_i32_1 : i32, i32, i32
  }
  func.func @transform_2(%arg0: i32) -> (i32, i32) {
    %c0_i32 = arith.constant 0 : i32
    %c0_i32_0 = arith.constant 0 : i32
    %c0_i32_1 = arith.constant 0 : i32
    return %c0_i32, %c0_i32_0 : i32, i32
  }
  func.func @transform_3(%arg0: i32) -> (i32, i32) {
    %c0_i32 = arith.constant 0 : i32
    %c0_i32_0 = arith.constant 0 : i32
    %c0_i32_1 = arith.constant 0 : i32
    return %c0_i32, %c0_i32_0 : i32, i32
  }
  func.func @transform_4(%arg0: i32) -> (i32, i32) {
    %c0_i32 = arith.constant 0 : i32
    %c0_i32_0 = arith.constant 0 : i32
    %c0_i32_1 = arith.constant 0 : i32
    return %c0_i32, %c0_i32_0 : i32, i32
  }
  func.func @transform_5(%arg0: i32) -> (i32, i32) {
    %c0_i32 = arith.constant 0 : i32
    %c0_i32_0 = arith.constant 0 : i32
    %c0_i32_1 = arith.constant 0 : i32
    return %c0_i32, %c0_i32_0 : i32, i32
  }
  func.func @transform_6(%arg0: i32) -> (i32, i32) {
    %c0_i32 = arith.constant 0 : i32
    %c0_i32_0 = arith.constant 0 : i32
    %c0_i32_1 = arith.constant 0 : i32
    return %c0_i32, %c0_i32_0 : i32, i32
  }
  func.func @transform_7(%arg0: i32) -> (i32, i32) {
    %c0_i32 = arith.constant 0 : i32
    %c0_i32_0 = arith.constant 0 : i32
    %c0_i32_1 = arith.constant 0 : i32
    return %c0_i32, %c0_i32_0 : i32, i32
  }
  func.func @transform_8(%arg0: i32) -> (i32, i32) {
    %c0_i32 = arith.constant 0 : i32
    %c0_i32_0 = arith.constant 0 : i32
    %c0_i32_1 = arith.constant 0 : i32
    return %c0_i32, %c0_i32_0 : i32, i32
  }
  func.func @transform_9(%arg0: i32) -> (i32, i32, i32) {
    %c0_i32 = arith.constant 0 : i32
    %c0_i32_0 = arith.constant 0 : i32
    %c0_i32_1 = arith.constant 0 : i32
    return %arg0, %c0_i32, %c0_i32_0 : i32, i32, i32
  }
}

</mosaic_0001>

<bundles_post_ra>
// kernel: div.5
= control target key start
LH: loop header
LB: loop body
LE: loop exit
PB: predicated region body
PF: predicated region fallthrough
CT: control target
= control target key end

     0   :  { %s206_s0 = inlined_call_operand.<no memory space> [shape: f32[], index: 0, kind: input, shape index: {}]   ;;  %s207_s1 = inlined_call_operand.vmem [shape: f32[256,1], index: 1, kind: output, shape index: {}]  }
   0x1   :  { %v2_v0 = vstv %s206_s0 }
   0x2   :  { %3 = vst [vmem:[%s207_s1] sm:$0xff] %v2_v0  ;;  %66 = vst [vmem:[%s207_s1 + $0x8] sm:$0xff] %v2_v0 }
   0x3   :  { %67 = vst [vmem:[%s207_s1 + $0x10] sm:$0xff] %v2_v0  ;;  %68 = vst [vmem:[%s207_s1 + $0x18] sm:$0xff] %v2_v0 }
   0x4   :  { %69 = vst [vmem:[%s207_s1 + $0x20] sm:$0xff] %v2_v0  ;;  %70 = vst [vmem:[%s207_s1 + $0x28] sm:$0xff] %v2_v0 }
   0x5   :  { %71 = vst [vmem:[%s207_s1 + $0x30] sm:$0xff] %v2_v0  ;;  %72 = vst [vmem:[%s207_s1 + $0x38] sm:$0xff] %v2_v0 }
   0x6   :  { %73 = vst [vmem:[%s207_s1 + $0x40] sm:$0xff] %v2_v0  ;;  %74 = vst [vmem:[%s207_s1 + $0x48] sm:$0xff] %v2_v0 }
   0x7   :  { %75 = vst [vmem:[%s207_s1 + $0x50] sm:$0xff] %v2_v0  ;;  %76 = vst [vmem:[%s207_s1 + $0x58] sm:$0xff] %v2_v0 }
   0x8   :  { %77 = vst [vmem:[%s207_s1 + $0x60] sm:$0xff] %v2_v0  ;;  %78 = vst [vmem:[%s207_s1 + $0x68] sm:$0xff] %v2_v0 }
   0x9   :  { %79 = vst [vmem:[%s207_s1 + $0x70] sm:$0xff] %v2_v0  ;;  %80 = vst [vmem:[%s207_s1 + $0x78] sm:$0xff] %v2_v0 }
   0xa   :  { %81 = vst [vmem:[%s207_s1 + $0x80] sm:$0xff] %v2_v0  ;;  %82 = vst [vmem:[%s207_s1 + $0x88] sm:$0xff] %v2_v0 }
   0xb   :  { %83 = vst [vmem:[%s207_s1 + $0x90] sm:$0xff] %v2_v0  ;;  %84 = vst [vmem:[%s207_s1 + $0x98] sm:$0xff] %v2_v0 }
   0xc   :  { %85 = vst [vmem:[%s207_s1 + $0xa0] sm:$0xff] %v2_v0  ;;  %86 = vst [vmem:[%s207_s1 + $0xa8] sm:$0xff] %v2_v0 }
   0xd   :  { %87 = vst [vmem:[%s207_s1 + $0xb0] sm:$0xff] %v2_v0  ;;  %88 = vst [vmem:[%s207_s1 + $0xb8] sm:$0xff] %v2_v0 }
   0xe   :  { %89 = vst [vmem:[%s207_s1 + $0xc0] sm:$0xff] %v2_v0  ;;  %90 = vst [vmem:[%s207_s1 + $0xc8] sm:$0xff] %v2_v0 }
   0xf   :  { %91 = vst [vmem:[%s207_s1 + $0xd0] sm:$0xff] %v2_v0  ;;  %92 = vst [vmem:[%s207_s1 + $0xd8] sm:$0xff] %v2_v0 }
  0x10   :  { %93 = vst [vmem:[%s207_s1 + $0xe0] sm:$0xff] %v2_v0  ;;  %94 = vst [vmem:[%s207_s1 + $0xe8] sm:$0xff] %v2_v0 }
  0x11   :  { %95 = vst [vmem:[%s207_s1 + $0xf0] sm:$0xff] %v2_v0  ;;  %96 = vst [vmem:[%s207_s1 + $0xf8] sm:$0xff] %v2_v0 }

// kernel: uncoiler_forward.1
= control target key start
LH: loop header
LB: loop body
LE: loop exit
PB: predicated region body
PF: predicated region fallthrough
CT: control target
= control target key end

     0   :  { %s1317_s30 = smov 0   ;;  %s1705_s0 = inlined_call_operand.vmem [shape: f32[2,8,256], index: 0, kind: input, shape index: {}]   ;;  %s1706_s1 = inlined_call_operand.vmem [shape: f32[9,1,256], index: 1, kind: input, shape index: {}]   ;;  %s1707_s2 = inlined_call_operand.vmem [shape: f32[256,1], index: 2, kind: input, shape index: {}]   ;;  %s1708_s3 = inlined_call_operand.vmem [shape: bf16[8,72], index: 3, kind: input, shape index: {}]   ;;  %s1709_s4 = inlined_call_operand.vmem [shape: f32[8,1], index: 4, kind: input, shape index: {}]   ;;  %s1710_s5 = inlined_call_operand.vmem [shape: bf16[8,8], index: 5, kind: input, shape index: {}]   ;;  %s1711_s6 = inlined_call_operand.vmem [shape: f32[8,1], index: 6, kind: input, shape index: {}]   ;;  %s1712_s7 = inlined_call_operand.vmem [shape: bf16[16,72], index: 7, kind: input, shape index: {}]   ;;  %s1713_s8 = inlined_call_operand.vmem [shape: f32[16,1], index: 8, kind: input, shape index: {}]   ;;  %s1714_s9 = inlined_call_operand.vmem [shape: f32[2,16,1], index: 9, kind: output, shape index: {}]  }
   0x1 LB: > { %s1126_s10 = sadd.s32 4294967295, %s1256_s30   ;;  %p1130_p0 = scmp.ge.s32.totalorder %s1256_s30, 1  ;;  %s1256_s30 = sphi %s1317_s30, %s19_s30  }
   0x2   : > { %p287_p1 = scmp.lt.s32.totalorder %s1256_s30, 3 }
   0x4   : > { %p288_p2 = pnand %p1130_p0, %p287_p1 }
   0x5   : > { %p323_p3 = scmp.lt.s32.totalorder (!%p288_p2), %s1126_s10, 1  ;;  %s1258_s15 = smov (!%p288_p2), 16   ;;  %v1264_v2 = vmov (!%p288_p2), 0   ;;  %v560_v3 = vld [vmem:[%s1709_s4] sm:$0xff] (!%p288_p2)  ;;  %v340_v4 = vlaneseq (!%p288_p2)  ;;  %v1138_v37 = vld [vmem:[%s1706_s1 + $0xa] sm:$0x3] (!%p288_p2) }
   0x6   : > { %291 = sbr.rel (%p288_p2) target bundleno = 1197 (0x4ad), region = 56  ;;  %s1259_s16 = smov (!%p288_p2), 17   ;;  %609 = vmatprep.mubr.bf16.mxu1 (!%p288_p2), %v1264_v2  ;;  %1247 = vset.pattern.permute.xlu0 (!%p288_p2), %v1264_v2  ;;  %v1135_v9 = vld [vmem:[%s1706_s1 + $0x2] sm:$0x3] (!%p288_p2)  ;;  %v345_v10 = vld [vmem:[%s1706_s1] sm:$0x3] (!%p288_p2) }
   0x7   : > { %s1260_s17 = smov (!%p288_p2), 15   ;;  %s1261_s18 = smov (!%p288_p2), 1   ;;  %671 = vmatprep.mubr.bf16.mxu0 (!%p288_p2), %v1264_v2  ;;  %1248 = vset.pattern.permute.xlu1 (!%p288_p2), %v1264_v2  ;;  %v348_v5 = vshrl.u32 (!%p288_p2), %v340_v4, 7  ;;  %v1376_v6 = vand.u32 (!%p288_p2), 127, %v340_v4  ;;  %v1136_v27 = vld [vmem:[%s1706_s1 + $0x4] sm:$0x3] (!%p288_p2) }
   0x8   : > { %s1262_s19 = smov (!%p288_p2), 127   ;;  %s1263_s20 = smov (!%p288_p2), 113   ;;  %v1137_v28 = vld [vmem:[%s1706_s1 + $0x6] sm:$0x3] (!%p288_p2)  ;;  %v1139_v58 = vld [vmem:[%s1706_s1 + $0xc] sm:$0x3] (!%p288_p2) }
   0x9   : > { %s1265_s21 = smov (!%p288_p2), 112   ;;  %s1266_s22 = smov (!%p288_p2), 111   ;;  %v1378_v7 = vsub.s32 (!%p288_p2), 0, %v348_v5  ;;  %v1380_v8 = vsub.s32 (!%p288_p2), 1, %v348_v5  ;;  %vm365_vm0 = vcmp.lt.s32.totalorder (!%p288_p2), %v1376_v6, 16  ;;  %vm342_vm1 = vcmp.lt.s32.totalorder (!%p288_p2), %v1376_v6, 17 }
   0xa   : > { %vm389_vm2 = vcmp.lt.s32.totalorder (!%p288_p2), %v1376_v6, 15  ;;  %vm413_vm3 = vcmp.lt.s32.totalorder (!%p288_p2), %v1376_v6, 1  ;;  %vm439_vm4 = vcmp.lt.s32.totalorder (!%p288_p2), %v1376_v6, 127  ;;  %v1140_v59 = vld [vmem:[%s1706_s1 + $0xe] sm:$0x3] (!%p288_p2)  ;;  %vm463_vm5 = vcmp.lt.s32.totalorder (!%p288_p2), %v1376_v6, 113 }
   0xb   : > { %v374_v13 = vrot.slane (!%p288_p2), %v1135_v9, %v1378_v7  ;;  %v350_v14 = vrot.slane (!%p288_p2), %v345_v10, %v1378_v7  ;;  %v354_v15 = vrot.slane (!%p288_p2), %v345_v10, %v1380_v8  ;;  %v378_v16 = vrot.slane (!%p288_p2), %v1135_v9, %v1380_v8  ;;  %v1141_v10 = vld [vmem:[%s1706_s1 + $0x10] sm:$0x3] (!%p288_p2) }
   0xc   : > { %v398_v33 = vrot.slane (!%p288_p2), %v1136_v27, %v1378_v7  ;;  %v402_v34 = vrot.slane (!%p288_p2), %v1136_v27, %v1380_v8  ;;  %v422_v35 = vrot.slane (!%p288_p2), %v1137_v28, %v1378_v7  ;;  %v426_v36 = vrot.slane (!%p288_p2), %v1137_v28, %v1380_v8 }
   0xd   : > { %s1716_s10 = smov (!%p323_p3, %s1126_s10), 1  ;;  %v448_v44 = vrot.slane %v1138_v37, %v1378_v7  ;;  %v452_v45 = vrot.slane %v1138_v37, %v1380_v8  ;;  %v476_v4 = vrot.slane %v1139_v58, %v1380_v8  ;;  %vm487_vm6 = vcmp.lt.s32.totalorder %v1376_v6, 112 }
   0xe   : > { %s1158_s11 = sshll.u32 %s1716_s10, 4  ;;  %v496_v5 = vrot.slane %v1140_v59, %v1378_v7  ;;  %v500_v9 = vrot.slane %v1140_v59, %v1380_v8  ;;  %vm511_vm7 = vcmp.lt.s32.totalorder %v1376_v6, 111  ;;  %vm570_vm8 = vcmask 1043456   ;;  %v962_v59 = vld [vmem:[%s1707_s2 + $0x8] sm:$0xff]  ;;  %v973_v6 = vld [vmem:[%s1707_s2 + $0x60] sm:$0xff] }
   0xf   : > { %s327_s14 = scalar_lea.vmem %s1705_s0, %s1158_s11  ;;  %vm566_vm9 = vcmask 588800   ;;  %vm629_vm10 = vcmask 64512   ;;  %s332_s25 = scalar_lea.vmem %s1714_s9, %s1158_s11  ;;  %vm1068_vm11 = vcmask 7168  }
  0x10   : > { %v1333_v0 = vld [vmem:[%s327_s14] sm:$0xff]  ;;  %v1339_v1 = vld [vmem:[%s327_s14 + $0x8] sm:$0xff] }
  0x11   : > { %361 = vrot.lane.b32.xlu1 %v1333_v0, %s1258_s15  ;;  %336 = vrot.lane.b32.xlu0 %v1333_v0, %s1259_s16 }
  0x15   : > { %363 = vrot.lane.b32.xlu1 %v1339_v1, %s1258_s15  ;;  %338 = vrot.lane.b32.xlu0 %v1339_v1, %s1259_s16 }
  0x19   : > { %387 = vrot.lane.b32.xlu1 %v1339_v1, %s1260_s17  ;;  %385 = vrot.lane.b32.xlu0 %v1333_v0, %s1260_s17 }
  0x1d   : > { %411 = vrot.lane.b32.xlu1 %v1339_v1, %s1261_s18  ;;  %409 = vrot.lane.b32.xlu0 %v1333_v0, %s1261_s18 }
  0x21   : > { %437 = vrot.lane.b32.xlu1 %v1339_v1, %s1262_s19  ;;  %435 = vrot.lane.b32.xlu0 %v1333_v0, %s1262_s19 }
  0x25   : > { %461 = vrot.lane.b32.xlu1 %v1339_v1, %s1263_s20  ;;  %459 = vrot.lane.b32.xlu0 %v1333_v0, %s1263_s20 }
  0x29   : > { %485 = vrot.lane.b32.xlu1 %v1339_v1, %s1265_s21  ;;  %483 = vrot.lane.b32.xlu0 %v1333_v0, %s1265_s21 }
  0x2d   : > { %509 = vrot.lane.b32.xlu1 %v1339_v1, %s1266_s22  ;;  %507 = vrot.lane.b32.xlu0 %v1333_v0, %s1266_s22 }
  0x31   : > { %563 = vperm.xlu0 %1247, %v560_v3   ;;  %v472_v3 = vrot.slane %v1139_v58, %v1378_v7 }
  0x83   : > { %v362_v11 = vpop.permute.xlu1 %361  ;;  %v337_v12 = vpop.permute.xlu0 %336 }
  0x87   : > { %v364_v17 = vpop.permute.xlu1 %363  ;;  %v339_v18 = vpop.permute.xlu0 %338 }
  0x88   : > { %v366_v19 = vsel %vm365_vm0, %v362_v11, %v364_v17  ;;  %v367_v20 = vsel %vm365_vm0, %v364_v17, %v362_v11  ;;  %v343_v21 = vsel %vm342_vm1, %v337_v12, %v339_v18  ;;  %v344_v22 = vsel %vm342_vm1, %v339_v18, %v337_v12 }
  0x89   : > { %v381_v23 = vmul.f32 %v374_v13, %v367_v20  ;;  %v357_v24 = vmul.f32 %v350_v14, %v344_v22  ;;  %v358_v25 = vmul.f32 %v354_v15, %v343_v21  ;;  %v382_v26 = vmul.f32 %v378_v16, %v366_v19 }
  0x8a   : > { %v520_v15 = vrot.slane %v1141_v10, %v1378_v7  ;;  %v524_v16 = vrot.slane %v1141_v10, %v1380_v8 }
  0x8b   : > { %v388_v29 = vpop.permute.xlu1 %387  ;;  %v386_v30 = vpop.permute.xlu0 %385  ;;  %v550_v31 = vpack.c.bf16 %v382_v26, %v358_v25  ;;  %v549_v32 = vpack.c.bf16 %v381_v23, %v357_v24 }
  0x8c   : > { %v390_v38 = vsel %vm389_vm2, %v386_v30, %v388_v29  ;;  %v391_v39 = vsel %vm389_vm2, %v388_v29, %v386_v30 }
  0x8d   : > { %577 = vmatprep.subr.bf16.mxu1 %v550_v31  ;;  %v405_v46 = vmul.f32 %v398_v33, %v391_v39  ;;  %v406_v47 = vmul.f32 %v402_v34, %v390_v38  ;;  %v623_v33 = vld [vmem:[%s1711_s6] sm:$0xff] }
  0x8e   : > { %578 = vmatpush1.bf16.msra.mxu1 %v549_v32  ;;  %v559_v32 = vld [vmem:[%s1708_s3] sm:$0xf]  ;;  %626 = vperm.xlu1 %1248, %v623_v33  }
  0x8f   : > { %v412_v40 = vpop.permute.xlu1 %411  ;;  %v410_v41 = vpop.permute.xlu0 %409 }
  0x90   : > { %v414_v42 = vsel %vm413_vm3, %v410_v41, %v412_v40  ;;  %v415_v43 = vsel %vm413_vm3, %v412_v40, %v410_v41 }
  0x91   : > { %v429_v48 = vmul.f32 %v422_v35, %v415_v43  ;;  %v430_v49 = vmul.f32 %v426_v36, %v414_v42 }
  0x93   : > { %v438_v50 = vpop.permute.xlu1 %437  ;;  %v436_v51 = vpop.permute.xlu0 %435  ;;  %v552_v52 = vpack.c.bf16 %v430_v49, %v406_v47  ;;  %v551_v53 = vpack.c.bf16 %v429_v48, %v405_v46 }
  0x94   : > { %v440_v54 = vsel %vm439_vm4, %v436_v51, %v438_v50  ;;  %v441_v55 = vsel %vm439_vm4, %v438_v50, %v436_v51 }
  0x95   : > { %v455_v56 = vmul.f32 %v448_v44, %v440_v54  ;;  %v456_v57 = vmul.f32 %v452_v45, %v441_v55  ;;  %579 = vmatprep.subr.bf16.mxu1 %v552_v52  ;;  %v889_v54 = vld [vmem:[%s1713_s8 + $0x8] sm:$0xff]  ;;  %v977_v55 = vld [vmem:[%s1707_s2 + $0x80] sm:$0xff] }
  0x96   : > { %580 = vmatpush1.bf16.msra.mxu1 %v551_v53  ;;  %v888_v53 = vld [vmem:[%s1713_s8] sm:$0xff] }
  0x97   : > { %v462_v60 = vpop.permute.xlu1 %461  ;;  %v460_v61 = vpop.permute.xlu0 %459  ;;  %v554_v62 = vpack.c.bf16 %v456_v57, %v1339_v1  ;;  %v553_v63 = vpack.c.bf16 %v455_v56, %v1333_v0  ;;  %v978_v56 = vld [vmem:[%s1707_s2 + $0x88] sm:$0xff]  ;;  %v961_v57 = vld [vmem:[%s1707_s2] sm:$0xff] }
  0x98   : > { %v464_v1 = vsel %vm463_vm5, %v460_v61, %v462_v60  ;;  %v465_v0 = vsel %vm463_vm5, %v462_v60, %v460_v61  ;;  %v1198_v58 = vpack.c.bf16 %v978_v56, %v977_v55  ;;  %v979_v60 = vld [vmem:[%s1707_s2 + $0x90] sm:$0xff]  ;;  %v980_v61 = vld [vmem:[%s1707_s2 + $0x98] sm:$0xff]  ;;  %v1148_v55 = vld [vmem:[%s1706_s1 + $0x6] sm:$0x3] }
  0x99   : > { %581 = vmatprep.subr.bf16.mxu1 %v554_v62  ;;  %v479_v17 = vmul.f32 %v472_v3, %v464_v1  ;;  %v480_v18 = vmul.f32 %v476_v4, %v465_v0  ;;  %v1200_v62 = vpack.c.bf16 %v962_v59, %v961_v57  ;;  %v963_v3 = vld [vmem:[%s1707_s2 + $0x10] sm:$0xff]  ;;  %v964_v4 = vld [vmem:[%s1707_s2 + $0x18] sm:$0xff]  ;;  %v965_v0 = vld [vmem:[%s1707_s2 + $0x20] sm:$0xff] }
  0x9a   : > { %582 = vmatpush1.bf16.msra.mxu1 %v553_v63  ;;  %v1202_v63 = vpack.c.bf16 %v980_v61, %v979_v60  ;;  %v1204_v10 = vpack.c.bf16 %v964_v4, %v963_v3  ;;  %v757_v61 = vrot.slane %v1148_v55, %v1378_v7 }
  0x9b   : > { %v486_v11 = vpop.permute.xlu1 %485  ;;  %v484_v12 = vpop.permute.xlu0 %483 }
  0x9c   : > { %v488_v13 = vsel %vm487_vm6, %v484_v12, %v486_v11  ;;  %v489_v14 = vsel %vm487_vm6, %v486_v11, %v484_v12  ;;  %v966_v11 = vld [vmem:[%s1707_s2 + $0x28] sm:$0xff]  ;;  %v983_v12 = vld [vmem:[%s1707_s2 + $0xb0] sm:$0xff] }
  0x9d   : > { %v503_v19 = vmul.f32 %v496_v5, %v488_v13  ;;  %v504_v20 = vmul.f32 %v500_v9, %v489_v14  ;;  %v981_v5 = vld [vmem:[%s1707_s2 + $0xa0] sm:$0xff]  ;;  %v982_v9 = vld [vmem:[%s1707_s2 + $0xa8] sm:$0xff]  ;;  %v984_v13 = vld [vmem:[%s1707_s2 + $0xb8] sm:$0xff]  ;;  %v1208_v14 = vpack.c.bf16 %v966_v11, %v965_v0 }
  0x9e   : > { %v1206_v1 = vpack.c.bf16 %v982_v9, %v981_v5 }
  0x9f   : > { %v510_v21 = vpop.permute.xlu1 %509  ;;  %v508_v22 = vpop.permute.xlu0 %507  ;;  %v556_v23 = vpack.c.bf16 %v504_v20, %v480_v18  ;;  %v555_v24 = vpack.c.bf16 %v503_v19, %v479_v17  ;;  %v968_v17 = vld [vmem:[%s1707_s2 + $0x38] sm:$0xff]  ;;  %v985_v18 = vld [vmem:[%s1707_s2 + $0xc0] sm:$0xff]  ;;  %v986_v19 = vld [vmem:[%s1707_s2 + $0xc8] sm:$0xff] }
  0xa0   : > { %v512_v25 = vsel %vm511_vm7, %v508_v22, %v510_v21  ;;  %v513_v26 = vsel %vm511_vm7, %v510_v21, %v508_v22  ;;  %v1214_v21 = vpack.c.bf16 %v986_v19, %v985_v18  ;;  %v969_v22 = vld [vmem:[%s1707_s2 + $0x40] sm:$0xff] }
  0xa1   : > { %v527_v27 = vmul.f32 %v520_v15, %v512_v25  ;;  %v528_v28 = vmul.f32 %v524_v16, %v513_v26  ;;  %583 = vmatprep.subr.bf16.mxu1 %v556_v23  ;;  %v1210_v15 = vpack.c.bf16 %v984_v13, %v983_v12  ;;  %v967_v16 = vld [vmem:[%s1707_s2 + $0x30] sm:$0xff]  ;;  %v970_v23 = vld [vmem:[%s1707_s2 + $0x48] sm:$0xff]  ;;  %v988_v25 = vld [vmem:[%s1707_s2 + $0xd8] sm:$0xff] }
  0xa2   : > { %584 = vmatpush1.bf16.msra.mxu1 %v555_v24  ;;  %v1212_v20 = vpack.c.bf16 %v968_v17, %v967_v16  ;;  %v987_v24 = vld [vmem:[%s1707_s2 + $0xd0] sm:$0xff]  ;;  %v1216_v26 = vpack.c.bf16 %v970_v23, %v969_v22 }
  0xa3   : > { %v557_v29 = vpack.c.bf16 %v527_v27, %v527_v27  ;;  %v558_v30 = vpack.c.bf16 %v528_v28, %v528_v28  ;;  %v1218_v27 = vpack.c.bf16 %v988_v25, %v987_v24  ;;  %v971_v28 = vld [vmem:[%s1707_s2 + $0x50] sm:$0xff]  ;;  %v1150_v25 = vld [vmem:[%s1706_s1 + $0xc] sm:$0x3] }
  0xa5   : > { %1142 = vmatprep.subr.msk.bf16.mxu1 %vm570_vm8, %v558_v30  ;;  %v572_v31 = vsel %vm570_vm8, %v557_v29, 0  ;;  %v972_v29 = vld [vmem:[%s1707_s2 + $0x58] sm:$0xff]  ;;  %v989_v30 = vld [vmem:[%s1707_s2 + $0xe0] sm:$0xff] }
  0xa6   : > { %586 = vmatpush1.bf16.msra.mxu1 %v572_v31  ;;  %v990_v31 = vld [vmem:[%s1707_s2 + $0xe8] sm:$0xff] }
  0xa7   : > { %v1222_v33 = vpack.c.bf16 %v990_v31, %v989_v30  ;;  %v803_v30 = vrot.slane %v1150_v25, %v1378_v7  ;;  %v807_v31 = vrot.slane %v1150_v25, %v1380_v8 }
  0xa9   : > { %1143 = vmatmul.mubr.msk.bf16.vlgmr.msra.gmra.mrb[0].mxu1 %vm566_vm9, %v559_v32  ;;  %v1220_v32 = vpack.c.bf16 %v972_v29, %v971_v28 }
  0xaa   : > { %946 = vmatprep.mubr.bf16.mxu1 %v1264_v2  ;;  %v620_v2 = vld [vmem:[%s1710_s5] sm:$0xf] }
  0xb0   : > { %v564_v34 = vpop.permute.xlu0 %563 }
 0x10d   : > { %v627_v46 = vpop.permute.xlu1 %626 }
 0x17c   : > { %v611_v35 = vpop.f32.mrb[0].mxu1 }
 0x17d   : > { %v612_v36 = vadd.f32 %v611_v35, %v564_v34  ;;  %v613_v37 = vpop.f32.mrb[1].mxu1  ;;  %v686_v35 = vld [vmem:[%s1706_s1] sm:$0x3] }
 0x17e   : > { %v614_v38 = vadd.f32 %v613_v37, %v564_v34  ;;  %v615_v39 = vpop.f32.mrb[2].mxu1 }
 0x17f   : > { %v618_v40 = vmax.f32 %v612_v36, 0.0  ;;  %v616_v41 = vpop.f32.mrb[3].mxu1  ;;  %v1146_v36 = vld [vmem:[%s1706_s1 + $0x2] sm:$0x3]  ;;  %v695_v39 = vrot.slane %v686_v35, %v1380_v8 }
 0x180   : > { %v619_v42 = vmax.f32 %v614_v38, 0.0  ;;  %v691_v38 = vrot.slane %v686_v35, %v1378_v7  ;;  %v717_v41 = vrot.slane %v1146_v36, %v1380_v8 }
 0x181   : > { %v621_v43 = vpack.c.bf16 %v618_v40, %v618_v40  ;;  %v713_v40 = vrot.slane %v1146_v36, %v1378_v7 }
 0x182   : > { %v622_v44 = vpack.c.bf16 %v619_v42, %v619_v42 }
 0x183   : > { %v634_v45 = vsel %vm570_vm8, %v621_v43, 0 }
 0x184   : > { %1144 = vmatprep.subr.msk.bf16.mxu0 %vm570_vm8, %v622_v44 }
 0x185   : > { %640 = vmatpush1.bf16.msra.mxu0 %v634_v45 }
 0x186   : > { %1199 = vmatprep.subr.bf16.mxu0 %v1198_v58 }
 0x188   : > { %1145 = vmatmul.mubr.msk.bf16.vlgmr.msra.gmra.mrb[0].mxu0 %vm629_vm10, %v620_v2 }
 0x189   : > { %1201 = vmatpush3.bf16.msra.mxu0 %v1200_v62  ;;  %v761_v62 = vrot.slane %v1148_v55, %v1380_v8  ;;  %v1249_v55 = vld [vmem:[%s1712_s7] sm:$0xff]  }
 0x18a   : > { %1203 = vmatprep.subr.bf16.mxu0 %v1202_v63  ;;  %v1149_v63 = vld [vmem:[%s1706_s1 + $0xa] sm:$0x3] }
 0x18b   : > { %v781_v0 = vrot.slane %v1149_v63, %v1378_v7  ;;  %v785_v11 = vrot.slane %v1149_v63, %v1380_v8 }
 0x18d   : > { %1205 = vmatpush3.bf16.msra.mxu0 %v1204_v10 }
 0x18e   : > { %1207 = vmatprep.subr.bf16.mxu0 %v1206_v1 }
 0x191   : > { %1209 = vmatpush3.bf16.msra.mxu0 %v1208_v14 }
 0x192   : > { %1211 = vmatprep.subr.bf16.mxu0 %v1210_v15 }
 0x195   : > { %1213 = vmatpush3.bf16.msra.mxu0 %v1212_v20 }
 0x196   : > { %1215 = vmatprep.subr.bf16.mxu0 %v1214_v21 }
 0x199   : > { %1217 = vmatpush3.bf16.msra.mxu0 %v1216_v26  ;;  %v1151_v26 = vld [vmem:[%s1706_s1 + $0xe] sm:$0x3] }
 0x19a   : > { %1219 = vmatprep.subr.bf16.mxu0 %v1218_v27 }
 0x19d   : > { %1221 = vmatpush3.bf16.msra.mxu0 %v1220_v32  ;;  %v825_v32 = vrot.slane %v1151_v26, %v1378_v7 }
 0x19e   : > { %1223 = vmatprep.subr.bf16.mxu0 %v1222_v33  ;;  %v829_v33 = vrot.slane %v1151_v26, %v1380_v8 }
 0x25b   : > { %v673_v47 = vpop.f32.mrb[0].mxu0 }
 0x25c   : > { %v1479_v48 = vadd.f32 %v673_v47, %v627_v46  ;;  %v675_v49 = vpop.f32.mrb[1].mxu0 }
 0x25d   : > { %v1481_v50 = vadd.f32 %v675_v49, %v627_v46  ;;  %v677_v51 = vpop.f32.mrb[2].mxu0 }
 0x25e   : > { %v678_v52 = vpop.f32.mrb[3].mxu0  ;;  %680 = vrot.lane.b32.xlu1 %v1479_v48, %s1259_s16 }
 0x25f   : > { %682 = vrot.lane.b32.xlu0 %v1481_v50, %s1259_s16 }
 0x262   : > { %702 = vrot.lane.b32.xlu1 %v1479_v48, %s1258_s15 }
 0x263   : > { %704 = vrot.lane.b32.xlu0 %v1481_v50, %s1258_s15 }
 0x266   : > { %724 = vrot.lane.b32.xlu1 %v1479_v48, %s1260_s17 }
 0x267   : > { %726 = vrot.lane.b32.xlu0 %v1481_v50, %s1260_s17 }
 0x26a   : > { %746 = vrot.lane.b32.xlu1 %v1479_v48, %s1261_s18 }
 0x26b   : > { %748 = vrot.lane.b32.xlu0 %v1481_v50, %s1261_s18 }
 0x26e   : > { %770 = vrot.lane.b32.xlu1 %v1479_v48, %s1262_s19 }
 0x26f   : > { %772 = vrot.lane.b32.xlu0 %v1481_v50, %s1262_s19 }
 0x272   : > { %792 = vrot.lane.b32.xlu1 %v1479_v48, %s1263_s20 }
 0x273   : > { %794 = vrot.lane.b32.xlu0 %v1481_v50, %s1263_s20 }
 0x276   : > { %814 = vrot.lane.b32.xlu1 %v1479_v48, %s1265_s21 }
 0x277   : > { %816 = vrot.lane.b32.xlu0 %v1481_v50, %s1265_s21 }
 0x27a   : > { %836 = vrot.lane.b32.xlu1 %v1479_v48, %s1266_s22 }
 0x27b   : > { %838 = vrot.lane.b32.xlu0 %v1481_v50, %s1266_s22 }
 0x27e   : > { %892 = vperm.xlu1 %1248, %v888_v53  }
 0x27f   : > { %897 = vperm.xlu0 %1247, %v889_v54   ;;  %v1147_v54 = vld [vmem:[%s1706_s1 + $0x4] sm:$0x3] }
 0x280   : > { %v735_v59 = vrot.slane %v1147_v54, %v1378_v7  ;;  %v739_v60 = vrot.slane %v1147_v54, %v1380_v8 }
 0x2d0   : > { %v681_v34 = vpop.permute.xlu1 %680 }
 0x2d1   : > { %v683_v37 = vpop.permute.xlu0 %682 }
 0x2d2   : > { %v684_v42 = vsel %vm342_vm1, %v681_v34, %v683_v37  ;;  %v685_v43 = vsel %vm342_vm1, %v683_v37, %v681_v34  ;;  %v1152_v34 = vld [vmem:[%s1706_s1 + $0x10] sm:$0x3] }
 0x2d3   : > { %v698_v47 = vmul.f32 %v691_v38, %v685_v43  ;;  %v699_v49 = vmul.f32 %v695_v39, %v684_v42  ;;  %v847_v39 = vrot.slane %v1152_v34, %v1378_v7 }
 0x2d4   : > { %v703_v44 = vpop.permute.xlu1 %702 }
 0x2d5   : > { %v705_v45 = vpop.permute.xlu0 %704 }
 0x2d6   : > { %v706_v2 = vsel %vm365_vm0, %v703_v44, %v705_v45  ;;  %v707_v46 = vsel %vm365_vm0, %v705_v45, %v703_v44 }
 0x2d7   : > { %v720_v51 = vmul.f32 %v713_v40, %v707_v46  ;;  %v721_v52 = vmul.f32 %v717_v41, %v706_v2  ;;  %v851_v40 = vrot.slane %v1152_v34, %v1380_v8 }
 0x2d8   : > { %v725_v53 = vpop.permute.xlu1 %724 }
 0x2d9   : > { %v876_v56 = vpack.c.bf16 %v720_v51, %v698_v47  ;;  %v727_v57 = vpop.permute.xlu0 %726  ;;  %v877_v58 = vpack.c.bf16 %v721_v52, %v699_v49 }
 0x2da   : > { %v728_v3 = vsel %vm389_vm2, %v725_v53, %v727_v57  ;;  %v729_v4 = vsel %vm389_vm2, %v727_v57, %v725_v53 }
 0x2db   : > { %914 = vmatprep.subr.bf16.mxu1 %v877_v58  ;;  %v742_v12 = vmul.f32 %v735_v59, %v729_v4  ;;  %v743_v13 = vmul.f32 %v739_v60, %v728_v3  ;;  %v991_v58 = vld [vmem:[%s1707_s2 + $0xf0] sm:$0xff]  ;;  %v992_v59 = vld [vmem:[%s1707_s2 + $0xf8] sm:$0xff] }
 0x2dc   : > { %915 = vmatpush1.bf16.msra.mxu1 %v876_v56  ;;  %v747_v5 = vpop.permute.xlu1 %746  ;;  %v974_v56 = vld [vmem:[%s1707_s2 + $0x68] sm:$0xff]  ;;  %v1226_v60 = vpack.c.bf16 %v992_v59, %v991_v58 }
 0x2dd   : > { %v749_v9 = vpop.permute.xlu0 %748  ;;  %v1224_v57 = vpack.c.bf16 %v974_v56, %v973_v6 }
 0x2de   : > { %v750_v10 = vsel %vm413_vm3, %v747_v5, %v749_v9  ;;  %v751_v1 = vsel %vm413_vm3, %v749_v9, %v747_v5 }
 0x2df   : > { %v764_v14 = vmul.f32 %v757_v61, %v751_v1  ;;  %v765_v15 = vmul.f32 %v761_v62, %v750_v10  ;;  %1225 = vmatpush3.bf16.msra.mxu0 %v1224_v57  ;;  %v975_v61 = vld [vmem:[%s1707_s2 + $0x70] sm:$0xff]  ;;  %v976_v62 = vld [vmem:[%s1707_s2 + $0x78] sm:$0xff] }
 0x2e0   : > { %v771_v16 = vpop.permute.xlu1 %770  ;;  %v1228_v63 = vpack.c.bf16 %v976_v62, %v975_v61  ;;  %1227 = vmatprep.subr.bf16.mxu0 %v1226_v60 }
 0x2e1   : > { %v878_v17 = vpack.c.bf16 %v764_v14, %v742_v12  ;;  %v773_v18 = vpop.permute.xlu0 %772  ;;  %v879_v19 = vpack.c.bf16 %v765_v15, %v743_v13 }
 0x2e2   : > { %v774_v20 = vsel %vm439_vm4, %v771_v16, %v773_v18  ;;  %v775_v21 = vsel %vm439_vm4, %v773_v18, %v771_v16 }
 0x2e3   : > { %v788_v22 = vmul.f32 %v781_v0, %v774_v20  ;;  %v789_v23 = vmul.f32 %v785_v11, %v775_v21  ;;  %916 = vmatprep.subr.bf16.mxu1 %v879_v19  ;;  %1229 = vmatpush3.bf16.msra.mxu0 %v1228_v63 }
 0x2e4   : > { %917 = vmatpush1.bf16.msra.mxu1 %v878_v17  ;;  %v793_v24 = vpop.permute.xlu1 %792 }
 0x2e5   : > { %v880_v27 = vpack.c.bf16 %v788_v22, %v1479_v48  ;;  %v795_v28 = vpop.permute.xlu0 %794  ;;  %v881_v29 = vpack.c.bf16 %v789_v23, %v1481_v50 }
 0x2e6   : > { %v796_v35 = vsel %vm463_vm5, %v793_v24, %v795_v28  ;;  %v797_v48 = vsel %vm463_vm5, %v795_v28, %v793_v24 }
 0x2e7   : > { %918 = vmatprep.subr.bf16.mxu1 %v881_v29  ;;  %v810_v41 = vmul.f32 %v803_v30, %v796_v35  ;;  %v811_v42 = vmul.f32 %v807_v31, %v797_v48 }
 0x2e8   : > { %919 = vmatpush1.bf16.msra.mxu1 %v880_v27  ;;  %v815_v50 = vpop.permute.xlu1 %814 }
 0x2e9   : > { %v817_v36 = vpop.permute.xlu0 %816 }
 0x2ea   : > { %v818_v37 = vsel %vm487_vm6, %v815_v50, %v817_v36  ;;  %v819_v38 = vsel %vm487_vm6, %v817_v36, %v815_v50 }
 0x2eb   : > { %v832_v43 = vmul.f32 %v825_v32, %v818_v37  ;;  %v833_v44 = vmul.f32 %v829_v33, %v819_v38 }
 0x2ec   : > { %v837_v45 = vpop.permute.xlu1 %836 }
 0x2ed   : > { %v882_v2 = vpack.c.bf16 %v832_v43, %v810_v41  ;;  %v839_v46 = vpop.permute.xlu0 %838  ;;  %v883_v47 = vpack.c.bf16 %v833_v44, %v811_v42 }
 0x2ee   : > { %v840_v49 = vsel %vm511_vm7, %v837_v45, %v839_v46  ;;  %v841_v51 = vsel %vm511_vm7, %v839_v46, %v837_v45 }
 0x2ef   : > { %v854_v52 = vmul.f32 %v847_v39, %v840_v49  ;;  %v855_v53 = vmul.f32 %v851_v40, %v841_v51  ;;  %920 = vmatprep.subr.bf16.mxu1 %v883_v47 }
 0x2f0   : > { %921 = vmatpush1.bf16.msra.mxu1 %v882_v2 }
 0x2f1   : > { %v884_v7 = vpack.c.bf16 %v854_v52, %v854_v52  ;;  %v885_v8 = vpack.c.bf16 %v855_v53, %v855_v53 }
 0x2f3   : > { %1154 = vmatprep.subr.msk.bf16.mxu1 %vm570_vm8, %v885_v8  ;;  %v909_v54 = vsel %vm570_vm8, %v884_v7, 0 }
 0x2f4   : > { %923 = vmatpush1.bf16.msra.mxu1 %v909_v54 }
 0x2f7   : > { %1155 = vmatmul.mubr.msk.bf16.vlgmr.msra.gmra.mrb[4].mxu1 %vm566_vm9, %v1249_v55 }
 0x2fd   : > { %v893_v3 = vpop.permute.xlu1 %892 }
 0x2fe   : > { %v898_v0 = vpop.permute.xlu0 %897 }
 0x3ca   : > { %v948_v4 = vpop.f32.mrb[4].mxu1 }
 0x3cb   : > { %v949_v5 = vadd.f32 %v948_v4, %v893_v3  ;;  %v950_v9 = vpop.f32.mrb[5].mxu1 }
 0x3cc   : > { %v951_v10 = vadd.f32 %v950_v9, %v893_v3  ;;  %v952_v1 = vpop.f32.mrb[6].mxu1 }
 0x3cd   : > { %v954_v11 = vpop.f32.mrb[7].mxu1  ;;  %v957_v14 = vmax.f32 %v949_v5, 0.0  ;;  %v953_v15 = vadd.f32 %v952_v1, %v898_v0 }
 0x3ce   : > { %v958_v12 = vmax.f32 %v951_v10, 0.0  ;;  %v955_v13 = vadd.f32 %v954_v11, %v898_v0 }
 0x3cf   : > { %v959_v17 = vmax.f32 %v953_v15, 0.0 }
 0x3d0   : > { %v960_v16 = vmax.f32 %v955_v13, 0.0  ;;  %1057 = vmatprep.mubr.f32.mxu0 %v958_v12 }
 0x3d1   : > { %1058 = vmatmul.mubr.f32.vlgmr.msra.gmra.mrb[4].mxu0 %v957_v14 }
 0x3d2   : > { %1062 = vmatprep.mubr.f32.mxu0 %v960_v16 }
 0x3d5   : > { %1063 = vmatmul.mubr.f32.gmra.mrb[6].mxu0 %v959_v17 }
 0x4a4   : > { %v1192_v18 = vpop.f32.mrb[4].mxu0 }
 0x4a5   : > { %v1193_v19 = vpop.f32.mrb[5].mxu0 }
 0x4a6   : > { %v1194_v20 = vadd.f32 %v1193_v19, %v1192_v18 }
 0x4a8   : > { %1069 = vst.msk [vmem:[%s332_s25] sm:$0xff] %vm1068_vm11, %v1194_v20  ;;  %v1195_v21 = vpop.f32.mrb[6].mxu0 }
 0x4a9   : > { %v1196_v22 = vpop.f32.mrb[7].mxu0 }
 0x4aa   : > { %v1197_v23 = vadd.f32 %v1196_v22, %v1195_v21 }
 0x4ac   : > { %1070 = vst.msk [vmem:[%s332_s25 + $0x8] sm:$0xff] %vm1068_vm11, %v1197_v23 }
 0x4ad PF: > { %s19_s30 = sadd.s32 1, %s1256_s30  }
 0x4ae   : > { %p16_p4 = scmp.ge.s32.totalorder %s19_s30, 4  }
 0x4b0   :  { %18 = sbr.rel (!%p16_p4) target bundleno = 1 (0x1), region = 93 }

</bundles_post_ra>
